<compile_context>
chip_gen: v7x
topology: tpu7x:2x2x1
jax: 0.10.0
libtpu: 0.0.40
codegen_flags: <defaults>
</compile_context>

<pallas_src>
import functools

import jax
import jax.numpy as jnp
from jax.experimental import pallas as pl
from jax.experimental.pallas import tpu as pltpu

EPS = 1e-3  # BatchNorm2d eps=0.001 in the PyTorch module


# ---------------------------------------------------------------------------
# Kernel 1: fused "stem" — all four 1x1 projections of x in one pass.
#   oa = relu(x @ Wa + ba)   (Wa = [branch1x1 | branch7x7_1 | branch7x7dbl_1])
#   ob = x @ Wb              (branch_pool 1x1, raw: pool + bias + relu later)
# BN scale already folded into Wa / Wb columns.
# ---------------------------------------------------------------------------
def _stem_kernel(x_ref, wa_ref, ba_ref, wb_ref, oa_ref, ob_ref):
    x = x_ref[...]
    acc_a = jnp.dot(x, wa_ref[...], preferred_element_type=jnp.float32)
    oa_ref[...] = jnp.maximum(acc_a + ba_ref[...], 0.0)
    ob_ref[...] = jnp.dot(x, wb_ref[...], preferred_element_type=jnp.float32)


def _pick_tm(m):
    # Largest tile in {1024, 512, 256, 128} that still gives >= 2 grid steps
    # (amortizes per-step pipeline overhead; keeps both v7x TCs busy).
    for tm in (1024, 512, 256, 128):
        if pl.cdiv(m, tm) >= 2:
            return tm
    return 128


def fused_stem(x_flat, wa, ba, wb):
    """x_flat: (M, Cin); wa: (Cin, Ca); ba: (Ca,); wb: (Cin, Cb)."""
    M, Cin = x_flat.shape
    Ca = wa.shape[1]
    Cb = wb.shape[1]
    tm = _pick_tm(M)
    Mp = pl.cdiv(M, tm) * tm
    if Mp != M:
        x_flat = jnp.pad(x_flat, ((0, Mp - M), (0, 0)))

    oa, ob = pl.pallas_call(
        _stem_kernel,
        out_shape=(jax.ShapeDtypeStruct((Mp, Ca), jnp.float32),
                   jax.ShapeDtypeStruct((Mp, Cb), jnp.float32)),
        grid_spec=pltpu.PrefetchScalarGridSpec(
            num_scalar_prefetch=0,
            grid=(Mp // tm,),
            in_specs=[
                pl.BlockSpec((tm, Cin), lambda i: (i, 0)),   # activation tile
                pl.BlockSpec((Cin, Ca), lambda i: (0, 0)),   # fused relu-head weights
                pl.BlockSpec((1, Ca), lambda i: (0, 0)),     # fused biases
                pl.BlockSpec((Cin, Cb), lambda i: (0, 0)),   # pool-head weights
            ],
            out_specs=[
                pl.BlockSpec((tm, Ca), lambda i: (i, 0)),
                pl.BlockSpec((tm, Cb), lambda i: (i, 0)),
            ],
        ),
        compiler_params=pltpu.CompilerParams(dimension_semantics=("parallel",)),
    )(x_flat, wa, ba.reshape(1, Ca), wb)
    return oa[:M], ob[:M]


# ---------------------------------------------------------------------------
# Kernel 2: 7-tap conv along axis 1 of (N, A, B, C), stride 1, pad 3.
# Input is padded + flattened per image to ((A+6)*B, C); tap k is a B-row
# shifted slice of the resident block — 7 accumulating matmuls, no im2col.
# ---------------------------------------------------------------------------
def _conv7_kernel(b_minor, x_ref, w_ref, b_ref, o_ref):
    # x_ref: (1, (A+6)*B, C); w_ref: (7, C, Cout); b_ref: (1, Cout)
    # o_ref: (1, A*B, Cout)
    m = o_ref.shape[1]
    cout = o_ref.shape[2]
    acc = jnp.zeros((m, cout), jnp.float32)
    for k in range(7):
        xk = x_ref[0, k * b_minor:k * b_minor + m, :]
        acc = acc + jnp.dot(xk, w_ref[k], preferred_element_type=jnp.float32)
    o_ref[0] = jnp.maximum(acc + b_ref[...], 0.0)


def conv7_along_axis1(x, w7, bias):
    """x: (N, A, B, C); w7: (7, C, Cout) (BN scale folded); bias: (Cout,)."""
    N, A, B, C = x.shape
    Cout = w7.shape[2]
    xp = jnp.pad(x, ((0, 0), (3, 3), (0, 0), (0, 0))).reshape(N, (A + 6) * B, C)

    out = pl.pallas_call(
        functools.partial(_conv7_kernel, B),
        out_shape=jax.ShapeDtypeStruct((N, A * B, Cout), jnp.float32),
        grid_spec=pltpu.PrefetchScalarGridSpec(
            num_scalar_prefetch=0,
            grid=(N,),
            in_specs=[
                pl.BlockSpec((1, (A + 6) * B, C), lambda n: (n, 0, 0)),
                pl.BlockSpec((7, C, Cout), lambda n: (0, 0, 0)),
                pl.BlockSpec((1, Cout), lambda n: (0, 0)),
            ],
            out_specs=pl.BlockSpec((1, A * B, Cout), lambda n: (n, 0, 0)),
        ),
        compiler_params=pltpu.CompilerParams(dimension_semantics=("parallel",)),
    )(xp, w7, bias.reshape(1, Cout))
    return out.reshape(N, A, B, Cout)


# ---------------------------------------------------------------------------
# Kernel 3: 3x3 avg pool (stride 1, pad 1, count_include_pad) + bias + ReLU,
# applied to the already-1x1-projected 192-channel tensor, gridded over N.
# ---------------------------------------------------------------------------
def _pool_bias_relu_kernel(x_ref, b_ref, o_ref):
    # x_ref: (1, H+2, W+2, C); b_ref: (1, 1, C); o_ref: (1, H, W, C)
    H = o_ref.shape[1]
    W = o_ref.shape[2]
    C = o_ref.shape[3]
    acc = jnp.zeros((H, W, C), jnp.float32)
    for di in range(3):
        for dj in range(3):
            acc = acc + x_ref[0, di:di + H, dj:dj + W, :]
    o_ref[0] = jnp.maximum(acc * (1.0 / 9.0) + b_ref[...], 0.0)


def pool3x3_bias_relu(z, bias):
    """z: (N, H, W, C) NHWC; bias: (C,)."""
    N, H, W, C = z.shape
    zp = jnp.pad(z, ((0, 0), (1, 1), (1, 1), (0, 0)))
    return pl.pallas_call(
        _pool_bias_relu_kernel,
        out_shape=jax.ShapeDtypeStruct((N, H, W, C), jnp.float32),
        grid_spec=pltpu.PrefetchScalarGridSpec(
            num_scalar_prefetch=0,
            grid=(N,),
            in_specs=[
                pl.BlockSpec((1, H + 2, W + 2, C), lambda n: (n, 0, 0, 0)),
                pl.BlockSpec((1, 1, C), lambda n: (0, 0, 0)),
            ],
            out_specs=pl.BlockSpec((1, H, W, C), lambda n: (n, 0, 0, 0)),
        ),
        compiler_params=pltpu.CompilerParams(dimension_semantics=("parallel",)),
    )(zp, bias.reshape(1, 1, C))


# ---------------------------------------------------------------------------
# Weight folding helpers (BN scale folded into conv weights at trace time)
# ---------------------------------------------------------------------------
def _w1x1_mat(w, s):
    # w: (Cout, Cin, 1, 1) -> (Cin, Cout), per-output-channel scale folded in.
    return w[:, :, 0, 0].T * s[None, :]


def _w7_taps(w, s, axis):
    # w: (Cout, Cin, kh, kw); returns (7, Cin, Cout) with BN scale folded.
    if axis == "h":                       # (7,1) conv: taps along kh
        taps = jnp.transpose(w[:, :, :, 0], (2, 1, 0))
    else:                                 # (1,7) conv: taps along kw
        taps = jnp.transpose(w[:, :, 0, :], (2, 1, 0))
    return taps * s[None, None, :]


# ---------------------------------------------------------------------------
# InceptionC parameters (deterministic synthetic init) and forward
# ---------------------------------------------------------------------------
def init_basic_conv(key, in_ch, out_ch, kernel_size):
    kw_, kg, kb, km, kv = jax.random.split(key, 5)
    kh, kwd = kernel_size
    w = 0.1 * jax.random.normal(kw_, (out_ch, in_ch, kh, kwd), jnp.float32)
    gamma = 1.0 + 0.1 * jax.random.normal(kg, (out_ch,), jnp.float32)
    beta = 0.1 * jax.random.normal(kb, (out_ch,), jnp.float32)
    mean = 0.1 * jax.random.normal(km, (out_ch,), jnp.float32)
    var = jax.random.uniform(kv, (out_ch,), jnp.float32, minval=0.5, maxval=1.5)
    return (w, gamma, beta, mean, var)


def init_inception_c(key, in_channels, channels_7x7):
    c7 = channels_7x7
    specs = [
        ("branch1x1",      (in_channels, 192, (1, 1))),
        ("branch7x7_1",    (in_channels, c7,  (1, 1))),
        ("branch7x7_2",    (c7,          c7,  (1, 7))),
        ("branch7x7_3",    (c7,          192, (7, 1))),
        ("branch7x7dbl_1", (in_channels, c7,  (1, 1))),
        ("branch7x7dbl_2", (c7,          c7,  (7, 1))),
        ("branch7x7dbl_3", (c7,          c7,  (1, 7))),
        ("branch7x7dbl_4", (c7,          c7,  (7, 1))),
        ("branch7x7dbl_5", (c7,          192, (1, 7))),
        ("branch_pool",    (in_channels, 192, (1, 1))),
    ]
    keys = jax.random.split(key, len(specs))
    params = {}
    for k, (name, (ci, co, ks)) in zip(keys, specs):
        params[name] = (init_basic_conv(k, ci, co, ks), ks)
    return params


def inception_c_forward(x_nchw, params):
    x = jnp.transpose(x_nchw, (0, 2, 3, 1))     # NCHW -> NHWC
    N, H, W, Cin = x.shape

    def folded(name):
        w, gamma, beta, mean, var = params[name][0]
        s = gamma / jnp.sqrt(var + EPS)
        bias = beta - mean * s
        return w, s, bias

    # ---- stage 1: every 1x1 head that reads x, fused into one matmul ----
    w_11, s_11, b_11 = folded("branch1x1")
    w_71, s_71, b_71 = folded("branch7x7_1")
    w_d1, s_d1, b_d1 = folded("branch7x7dbl_1")
    w_po, s_po, b_po = folded("branch_pool")
    c7 = w_71.shape[0]

    wa = jnp.concatenate([_w1x1_mat(w_11, s_11),
                          _w1x1_mat(w_71, s_71),
                          _w1x1_mat(w_d1, s_d1)], axis=1)       # (Cin, 192+2*c7)
    ba = jnp.concatenate([b_11, b_71, b_d1])
    wb = _w1x1_mat(w_po, s_po)                                  # (Cin, 192)

    oa, zpool = fused_stem(x.reshape(N * H * W, Cin), wa, ba, wb)

    branch1x1 = oa[:, :192].reshape(N, H, W, 192)
    b7 = oa[:, 192:192 + c7].reshape(N, H, W, c7)
    bd = oa[:, 192 + c7:192 + 2 * c7].reshape(N, H, W, c7)

    # ---- 1x7 / 7x1 convs as shift-accumulate matmuls (no im2col) ----
    def conv_7x1(t, name):
        w, s, bias = folded(name)
        return conv7_along_axis1(t, _w7_taps(w, s, "h"), bias)

    def conv_1x7(t, name):
        w, s, bias = folded(name)
        tt = jnp.transpose(t, (0, 2, 1, 3))     # put W on axis 1
        out = conv7_along_axis1(tt, _w7_taps(w, s, "w"), bias)
        return jnp.transpose(out, (0, 2, 1, 3))

    b7 = conv_1x7(b7, "branch7x7_2")
    branch7x7 = conv_7x1(b7, "branch7x7_3")

    bd = conv_7x1(bd, "branch7x7dbl_2")
    bd = conv_1x7(bd, "branch7x7dbl_3")
    bd = conv_7x1(bd, "branch7x7dbl_4")
    branch7x7dbl = conv_1x7(bd, "branch7x7dbl_5")

    # ---- branch_pool: avg-pool the already-projected 192-ch tensor ----
    branch_pool = pool3x3_bias_relu(zpool.reshape(N, H, W, 192), b_po)

    out = jnp.concatenate([branch1x1, branch7x7, branch7x7dbl, branch_pool],
                          axis=-1)              # (N, H, W, 768)
    return jnp.transpose(out, (0, 3, 1, 2))     # NHWC -> NCHW


# ---------------------------------------------------------------------------
# Pure-JAX reference (lax.conv) for a correctness cross-check
# ---------------------------------------------------------------------------
def _ref_basic_conv(x, p, ks):
    w, gamma, beta, mean, var = p
    kh, kw = ks
    pad = ((kh // 2, kh // 2), (kw // 2, kw // 2))
    y = jax.lax.conv_general_dilated(
        x, w, (1, 1), pad, dimension_numbers=("NCHW", "OIHW", "NCHW"))
    s = gamma / jnp.sqrt(var + EPS)
    b = beta - mean * s
    return jnp.maximum(y * s[None, :, None, None] + b[None, :, None, None], 0.0)


def _ref_avg_pool(x):
    y = jax.lax.reduce_window(
        x, 0.0, jax.lax.add, (1, 1, 3, 3), (1, 1, 1, 1),
        [(0, 0), (0, 0), (1, 1), (1, 1)])
    return y / 9.0


def inception_c_reference(x, params):
    def apply(name, inp):
        p, ks = params[name]
        return _ref_basic_conv(inp, p, ks)

    b1 = apply("branch1x1", x)
    b7 = apply("branch7x7_3", apply("branch7x7_2", apply("branch7x7_1", x)))
    bd = apply("branch7x7dbl_1", x)
    bd = apply("branch7x7dbl_2", bd)
    bd = apply("branch7x7dbl_3", bd)
    bd = apply("branch7x7dbl_4", bd)
    bd = apply("branch7x7dbl_5", bd)
    bp = apply("branch_pool", _ref_avg_pool(x))
    return jnp.concatenate([b1, b7, bd, bp], axis=1)


if __name__ == "__main__":
    key = jax.random.PRNGKey(0)
    kx, kp = jax.random.split(key)

    N, C_in, H, W = 2, 8, 16, 16
    channels_7x7 = 8

    x = jax.random.normal(kx, (N, C_in, H, W), jnp.float32)
    params = init_inception_c(kp, C_in, channels_7x7)

    out = jax.block_until_ready(inception_c_forward(x, params))
    ref = jax.block_until_ready(inception_c_reference(x, params))

    assert out.shape == (N, 192 * 4, H, W), out.shape
    max_err = float(jnp.max(jnp.abs(out - ref)))
    assert jnp.allclose(out, ref, atol=1e-3, rtol=1e-3), f"max abs err {max_err}"

    print("KERNEL_OK")
</pallas_src>

<mosaic_0001>
module attributes {stable_mosaic.version = 11 : i64} {
  func.func @_stem_kernel(%arg0: i32, %arg1: memref<256x8xf32, #tpu.memory_space<vmem>>, %arg2: memref<8x208xf32, #tpu.memory_space<vmem>>, %arg3: memref<1x208xf32, #tpu.memory_space<vmem>>, %arg4: memref<8x192xf32, #tpu.memory_space<vmem>>, %arg5: memref<256x208xf32, #tpu.memory_space<vmem>>, %arg6: memref<256x192xf32, #tpu.memory_space<vmem>>) attributes {dimension_semantics = [#tpu.dimension_semantics<parallel>], iteration_bounds = array<i64: 2>, scalar_prefetch = 0 : i64, scratch_operands = 0 : i64, tpu.core_type = #tpu.core_type<tc>, window_params = [{transform_indices = @transform_0, window_bounds = array<i64: 256, 8>}, {pipeline_mode = #tpu.pipeline_mode<synchronous>, transform_indices = @transform_1, window_bounds = array<i64: 8, 208>}, {pipeline_mode = #tpu.pipeline_mode<synchronous>, transform_indices = @transform_2, window_bounds = array<i64: 1, 208>}, {pipeline_mode = #tpu.pipeline_mode<synchronous>, transform_indices = @transform_3, window_bounds = array<i64: 8, 192>}, {transform_indices = @transform_4, window_bounds = array<i64: 256, 208>}, {transform_indices = @transform_5, window_bounds = array<i64: 256, 192>}]} {
    %c0 = arith.constant 0 : index
    %c0_0 = arith.constant 0 : index
    %0 = vector.load %arg1[%c0, %c0_0] : memref<256x8xf32, #tpu.memory_space<vmem>>, vector<256x8xf32>
    %c0_1 = arith.constant 0 : index
    %c0_2 = arith.constant 0 : index
    %1 = vector.load %arg2[%c0_1, %c0_2] : memref<8x208xf32, #tpu.memory_space<vmem>>, vector<8x208xf32>
    %cst = arith.constant dense<0.000000e+00> : vector<256x208xf32>
    %2 = tpu.matmul %0, %1, %cst {dimension_numbers = #tpu.dot_dimension_numbers<[1], [0], [0], [1], [0, 0, 1, 1], [], []>} : vector<256x8xf32>, vector<8x208xf32>, vector<256x208xf32> -> vector<256x208xf32>
    %c0_3 = arith.constant 0 : index
    %c0_4 = arith.constant 0 : index
    %3 = vector.load %arg3[%c0_3, %c0_4] : memref<1x208xf32, #tpu.memory_space<vmem>>, vector<1x208xf32>
    %4 = vector.broadcast %3 : vector<1x208xf32> to vector<256x208xf32>
    %5 = arith.addf %2, %4 : vector<256x208xf32>
    %cst_5 = arith.constant 0.000000e+00 : f32
    %6 = vector.broadcast %cst_5 : f32 to vector<256x208xf32>
    %7 = arith.maximumf %5, %6 : vector<256x208xf32>
    %c0_6 = arith.constant 0 : index
    %c0_7 = arith.constant 0 : index
    %8 = vector.load %arg5[%c0_6, %c0_7] : memref<256x208xf32, #tpu.memory_space<vmem>>, vector<256x208xf32>
    tpu.vector_store %arg5[%c0_6, %c0_7], %7 {strides = array<i32>} : memref<256x208xf32, #tpu.memory_space<vmem>>, vector<256x208xf32>,
    %c0_8 = arith.constant 0 : index
    %c0_9 = arith.constant 0 : index
    %9 = vector.load %arg4[%c0_8, %c0_9] : memref<8x192xf32, #tpu.memory_space<vmem>>, vector<8x192xf32>
    %cst_10 = arith.constant dense<0.000000e+00> : vector<256x192xf32>
    %10 = tpu.matmul %0, %9, %cst_10 {dimension_numbers = #tpu.dot_dimension_numbers<[1], [0], [0], [1], [0, 0, 1, 1], [], []>} : vector<256x8xf32>, vector<8x192xf32>, vector<256x192xf32> -> vector<256x192xf32>
    %c0_11 = arith.constant 0 : index
    %c0_12 = arith.constant 0 : index
    %11 = vector.load %arg6[%c0_11, %c0_12] : memref<256x192xf32, #tpu.memory_space<vmem>>, vector<256x192xf32>
    tpu.vector_store %arg6[%c0_11, %c0_12], %10 {strides = array<i32>} : memref<256x192xf32, #tpu.memory_space<vmem>>, vector<256x192xf32>,
    return
  }
  func.func @transform_0(%arg0: i32) -> (i32, i32) {
    %c0_i32 = arith.constant 0 : i32
    %c0_i32_0 = arith.constant 0 : i32
    return %arg0, %c0_i32 : i32, i32
  }
  func.func @transform_1(%arg0: i32) -> (i32, i32) {
    %c0_i32 = arith.constant 0 : i32
    %c0_i32_0 = arith.constant 0 : i32
    %c0_i32_1 = arith.constant 0 : i32
    return %c0_i32, %c0_i32_0 : i32, i32
  }
  func.func @transform_2(%arg0: i32) -> (i32, i32) {
    %c0_i32 = arith.constant 0 : i32
    %c0_i32_0 = arith.constant 0 : i32
    %c0_i32_1 = arith.constant 0 : i32
    return %c0_i32, %c0_i32_0 : i32, i32
  }
  func.func @transform_3(%arg0: i32) -> (i32, i32) {
    %c0_i32 = arith.constant 0 : i32
    %c0_i32_0 = arith.constant 0 : i32
    %c0_i32_1 = arith.constant 0 : i32
    return %c0_i32, %c0_i32_0 : i32, i32
  }
  func.func @transform_4(%arg0: i32) -> (i32, i32) {
    %c0_i32 = arith.constant 0 : i32
    %c0_i32_0 = arith.constant 0 : i32
    return %arg0, %c0_i32 : i32, i32
  }
  func.func @transform_5(%arg0: i32) -> (i32, i32) {
    %c0_i32 = arith.constant 0 : i32
    %c0_i32_0 = arith.constant 0 : i32
    return %arg0, %c0_i32 : i32, i32
  }
}

</mosaic_0001>

<bundles_post_ra>
// kernel: tpu_custom_call.1
= control target key start
LH: loop header
LB: loop body
LE: loop exit
PB: predicated region body
PF: predicated region fallthrough
CT: control target
= control target key end

     0   :  { %s1322_s18 = smov 0   ;;  %s1787_s0 = inlined_call_operand.vmem [shape: f32[512,8], index: 0, kind: input, shape index: {}]   ;;  %s1788_s1 = inlined_call_operand.vmem [shape: f32[8,208], index: 1, kind: input, shape index: {}]   ;;  %s1789_s2 = inlined_call_operand.vmem [shape: f32[1,208], index: 2, kind: input, shape index: {}]   ;;  %s1790_s3 = inlined_call_operand.vmem [shape: f32[8,192], index: 3, kind: input, shape index: {}]   ;;  %s1791_s4 = inlined_call_operand.vmem [shape: f32[512,208], index: 4, kind: output, shape index: {0}]   ;;  %s1792_s5 = inlined_call_operand.vmem [shape: f32[512,192], index: 5, kind: output, shape index: {1}]  }
   0x1 LB: > { %s1193_s19 = sadd.s32 4294967295, %s1289_s18   ;;  %p1197_p0 = scmp.ge.s32.totalorder %s1289_s18, 1  ;;  %s1289_s18 = sphi %s1322_s18, %s16_s18  }
   0x2   : > { %p191_p1 = scmp.lt.s32.totalorder %s1289_s18, 3 }
   0x4   : > { %p192_p2 = pnand %p1197_p0, %p191_p1 }
   0x5   : > { %v279_v0 = vld [vmem:[%s1788_s1 + $0x8] sm:$0xff] (!%p192_p2)  ;;  %v278_v1 = vld [vmem:[%s1788_s1] sm:$0xff] (!%p192_p2)  ;;  %s1198_s24 = sshll.u32 (!%p192_p2), %s1193_s19, 5  ;;  %v1291_v3 = vmov (!%p192_p2), 0.0   ;;  %vm292_vm0 = vcmask (!%p192_p2), 64512   ;;  %v282_v37 = vlaneseq (!%p192_p2)  ;;  %vm1035_vm1 = vcmask (!%p192_p2), 523264  }
   0x6   : > { %195 = sbr.rel (%p192_p2) target bundleno = 359 (0x167), region = 36  ;;  %v776_v2 = vld [vmem:[%s1790_s3 + $0x8] sm:$0xff] (!%p192_p2)  ;;  %389 = vmatprep.subr.mxu0 (!%p192_p2), %v279_v0  ;;  %453 = vmatprep.mubr.f32.mxu0 (!%p192_p2), %v1291_v3  ;;  %p227_p3 = scmp.lt.s32.totalorder (!%p192_p2), %s1198_s24, 63  ;;  %v775_v4 = vld [vmem:[%s1790_s3] sm:$0xff] (!%p192_p2)  ;;  %vm711_vm2 = vcmask (!%p192_p2), 654336  }
   0x7   : > { %390 = vmatpush1.msra.mxu0 (!%p192_p2), %v278_v1  ;;  %777 = vmatprep.subr.mxu1 (!%p192_p2), %v776_v2  ;;  %v283_v38 = vshrl.u32 (!%p192_p2), %v282_v37, 7  ;;  %v280_v40 = vld [vmem:[%s1789_s2] sm:$0x3] (!%p192_p2) }
   0x8   : > { %778 = vmatpush1.msra.mxu1 (!%p192_p2), %v775_v4  ;;  %841 = vmatprep.mubr.f32.mxu1 (!%p192_p2), %v1291_v3 }
   0x9   : > { %v284_v39 = vsub.s32 (!%p192_p2), 0, %v283_v38  ;;  %v288_v41 = vsub.s32 (!%p192_p2), 1, %v283_v38 }
   0xb   : > { %v1514_v42 = vrot.slane (!%p192_p2), %v280_v40, %v284_v39  ;;  %v1516_v43 = vrot.slane (!%p192_p2), %v280_v40, %v288_v41 }
   0xd   : > { %s1794_s24 = smov (!%p227_p3, %s1198_s24), 63 }
   0xe   : > { %s1199_s29 = sshll.u32 %s1794_s24, 3  ;;  %s1272_s10 = sshll.u32 %s1794_s24, 4 }
   0xf   : > { %s1350_s7 = scalar_lea.vmem %s1787_s0, %s1199_s29  ;;  %s1521_s13 = scalar_lea.vmem %s1792_s5, %s1272_s10 }
  0x10   : > { %v246_v5 = vld [vmem:[%s1350_s7] sm:$0xff]  ;;  %v247_v6 = vld [vmem:[%s1350_s7 + $0x8] sm:$0xff]  ;;  %v248_v7 = vld [vmem:[%s1350_s7 + $0x10] sm:$0xff]  ;;  %s1528_s16 = scalar_lea.vmem %s1791_s4, %s1272_s10 }
  0x11   : > { %1206 = vmatmul.mubr.msk.f32.vlgmr.msra.gmra.mrb[0].mxu0 %vm292_vm0, %v246_v5  ;;  %1238 = vmatmul.mubr.msk.f32.vlgmr.msra.gmra.mrb[0].mxu1 %vm292_vm0, %v246_v5  ;;  %v249_v8 = vld [vmem:[%s1350_s7 + $0x18] sm:$0xff]  ;;  %v250_v9 = vld [vmem:[%s1350_s7 + $0x20] sm:$0xff]  ;;  %v251_v10 = vld [vmem:[%s1350_s7 + $0x28] sm:$0xff] }
  0x12   : > { %459 = vmatprep.mubr.f32.mxu0 %v1291_v3  ;;  %847 = vmatprep.mubr.f32.mxu1 %v1291_v3  ;;  %v252_v11 = vld [vmem:[%s1350_s7 + $0x30] sm:$0xff]  ;;  %v253_v12 = vld [vmem:[%s1350_s7 + $0x38] sm:$0xff]  ;;  %v254_v13 = vld [vmem:[%s1350_s7 + $0x40] sm:$0xff] }
  0x13   : > { %v255_v14 = vld [vmem:[%s1350_s7 + $0x48] sm:$0xff]  ;;  %v256_v15 = vld [vmem:[%s1350_s7 + $0x50] sm:$0xff]  ;;  %v257_v16 = vld [vmem:[%s1350_s7 + $0x58] sm:$0xff] }
  0x14   : > { %v258_v17 = vld [vmem:[%s1350_s7 + $0x60] sm:$0xff]  ;;  %v259_v18 = vld [vmem:[%s1350_s7 + $0x68] sm:$0xff]  ;;  %v260_v19 = vld [vmem:[%s1350_s7 + $0x70] sm:$0xff] }
  0x15   : > { %1207 = vmatmul.mubr.msk.f32.gmra.mrb[2].mxu0 %vm292_vm0, %v247_v6  ;;  %1239 = vmatmul.mubr.msk.f32.gmra.mrb[2].mxu1 %vm292_vm0, %v247_v6  ;;  %v261_v20 = vld [vmem:[%s1350_s7 + $0x78] sm:$0xff]  ;;  %v262_v21 = vld [vmem:[%s1350_s7 + $0x80] sm:$0xff]  ;;  %v263_v22 = vld [vmem:[%s1350_s7 + $0x88] sm:$0xff] }
  0x16   : > { %465 = vmatprep.mubr.f32.mxu0 %v1291_v3  ;;  %853 = vmatprep.mubr.f32.mxu1 %v1291_v3  ;;  %v264_v23 = vld [vmem:[%s1350_s7 + $0x90] sm:$0xff]  ;;  %v265_v24 = vld [vmem:[%s1350_s7 + $0x98] sm:$0xff]  ;;  %v266_v25 = vld [vmem:[%s1350_s7 + $0xa0] sm:$0xff] }
  0x17   : > { %v267_v26 = vld [vmem:[%s1350_s7 + $0xa8] sm:$0xff]  ;;  %v268_v27 = vld [vmem:[%s1350_s7 + $0xb0] sm:$0xff]  ;;  %v269_v28 = vld [vmem:[%s1350_s7 + $0xb8] sm:$0xff] }
  0x18   : > { %v270_v29 = vld [vmem:[%s1350_s7 + $0xc0] sm:$0xff]  ;;  %v271_v30 = vld [vmem:[%s1350_s7 + $0xc8] sm:$0xff]  ;;  %v272_v31 = vld [vmem:[%s1350_s7 + $0xd0] sm:$0xff] }
  0x19   : > { %1208 = vmatmul.mubr.msk.f32.gmra.mrb[4].mxu0 %vm292_vm0, %v248_v7  ;;  %1240 = vmatmul.mubr.msk.f32.gmra.mrb[4].mxu1 %vm292_vm0, %v248_v7  ;;  %v273_v32 = vld [vmem:[%s1350_s7 + $0xd8] sm:$0xff]  ;;  %v274_v33 = vld [vmem:[%s1350_s7 + $0xe0] sm:$0xff]  ;;  %v275_v34 = vld [vmem:[%s1350_s7 + $0xe8] sm:$0xff] }
  0x1a   : > { %471 = vmatprep.mubr.f32.mxu0 %v1291_v3  ;;  %859 = vmatprep.mubr.f32.mxu1 %v1291_v3  ;;  %v276_v35 = vld [vmem:[%s1350_s7 + $0xf0] sm:$0xff]  ;;  %v277_v36 = vld [vmem:[%s1350_s7 + $0xf8] sm:$0xff] }
  0x1d   : > { %1209 = vmatmul.mubr.msk.f32.gmra.mrb[6].mxu0 %vm292_vm0, %v249_v8  ;;  %1241 = vmatmul.mubr.msk.f32.gmra.mrb[6].mxu1 %vm292_vm0, %v249_v8 }
  0x1e   : > { %477 = vmatprep.mubr.f32.mxu0 %v1291_v3  ;;  %865 = vmatprep.mubr.f32.mxu1 %v1291_v3 }
  0x21   : > { %1210 = vmatmul.mubr.msk.f32.gmra.mrb[8].mxu0 %vm292_vm0, %v250_v9  ;;  %1242 = vmatmul.mubr.msk.f32.gmra.mrb[8].mxu1 %vm292_vm0, %v250_v9 }
  0x22   : > { %483 = vmatprep.mubr.f32.mxu0 %v1291_v3  ;;  %871 = vmatprep.mubr.f32.mxu1 %v1291_v3 }
  0x25   : > { %1211 = vmatmul.mubr.msk.f32.gmra.mrb[10].mxu0 %vm292_vm0, %v251_v10  ;;  %1243 = vmatmul.mubr.msk.f32.gmra.mrb[10].mxu1 %vm292_vm0, %v251_v10 }
  0x26   : > { %489 = vmatprep.mubr.f32.mxu0 %v1291_v3  ;;  %877 = vmatprep.mubr.f32.mxu1 %v1291_v3 }
  0x29   : > { %1212 = vmatmul.mubr.msk.f32.gmra.mrb[12].mxu0 %vm292_vm0, %v252_v11  ;;  %1244 = vmatmul.mubr.msk.f32.gmra.mrb[12].mxu1 %vm292_vm0, %v252_v11 }
  0x2a   : > { %495 = vmatprep.mubr.f32.mxu0 %v1291_v3  ;;  %883 = vmatprep.mubr.f32.mxu1 %v1291_v3 }
  0x2d   : > { %1213 = vmatmul.mubr.msk.f32.gmra.mrb[14].mxu0 %vm292_vm0, %v253_v12  ;;  %1245 = vmatmul.mubr.msk.f32.gmra.mrb[14].mxu1 %vm292_vm0, %v253_v12 }
  0x2e   : > { %501 = vmatprep.mubr.f32.mxu0 %v1291_v3  ;;  %889 = vmatprep.mubr.f32.mxu1 %v1291_v3 }
  0x31   : > { %1214 = vmatmul.mubr.msk.f32.gmra.mrb[16].mxu0 %vm292_vm0, %v254_v13  ;;  %1246 = vmatmul.mubr.msk.f32.gmra.mrb[16].mxu1 %vm292_vm0, %v254_v13 }
  0x32   : > { %507 = vmatprep.mubr.f32.mxu0 %v1291_v3  ;;  %895 = vmatprep.mubr.f32.mxu1 %v1291_v3 }
  0x35   : > { %1215 = vmatmul.mubr.msk.f32.gmra.mrb[18].mxu0 %vm292_vm0, %v255_v14  ;;  %1247 = vmatmul.mubr.msk.f32.gmra.mrb[18].mxu1 %vm292_vm0, %v255_v14 }
  0x36   : > { %513 = vmatprep.mubr.f32.mxu0 %v1291_v3  ;;  %901 = vmatprep.mubr.f32.mxu1 %v1291_v3 }
  0x39   : > { %1216 = vmatmul.mubr.msk.f32.gmra.mrb[20].mxu0 %vm292_vm0, %v256_v15  ;;  %1248 = vmatmul.mubr.msk.f32.gmra.mrb[20].mxu1 %vm292_vm0, %v256_v15 }
  0x3a   : > { %519 = vmatprep.mubr.f32.mxu0 %v1291_v3  ;;  %907 = vmatprep.mubr.f32.mxu1 %v1291_v3 }
  0x3d   : > { %1217 = vmatmul.mubr.msk.f32.gmra.mrb[22].mxu0 %vm292_vm0, %v257_v16  ;;  %1249 = vmatmul.mubr.msk.f32.gmra.mrb[22].mxu1 %vm292_vm0, %v257_v16 }
  0x3e   : > { %525 = vmatprep.mubr.f32.mxu0 %v1291_v3  ;;  %913 = vmatprep.mubr.f32.mxu1 %v1291_v3 }
  0x41   : > { %1218 = vmatmul.mubr.msk.f32.gmra.mrb[24].mxu0 %vm292_vm0, %v258_v17  ;;  %1250 = vmatmul.mubr.msk.f32.gmra.mrb[24].mxu1 %vm292_vm0, %v258_v17 }
  0x42   : > { %531 = vmatprep.mubr.f32.mxu0 %v1291_v3  ;;  %919 = vmatprep.mubr.f32.mxu1 %v1291_v3 }
  0x45   : > { %1219 = vmatmul.mubr.msk.f32.gmra.mrb[26].mxu0 %vm292_vm0, %v259_v18  ;;  %1251 = vmatmul.mubr.msk.f32.gmra.mrb[26].mxu1 %vm292_vm0, %v259_v18 }
  0x46   : > { %537 = vmatprep.mubr.f32.mxu0 %v1291_v3  ;;  %925 = vmatprep.mubr.f32.mxu1 %v1291_v3 }
  0x49   : > { %1220 = vmatmul.mubr.msk.f32.gmra.mrb[28].mxu0 %vm292_vm0, %v260_v19  ;;  %1252 = vmatmul.mubr.msk.f32.gmra.mrb[28].mxu1 %vm292_vm0, %v260_v19 }
  0x4a   : > { %543 = vmatprep.mubr.f32.mxu0 %v1291_v3  ;;  %931 = vmatprep.mubr.f32.mxu1 %v1291_v3 }
  0x4d   : > { %1221 = vmatmul.mubr.msk.f32.gmra.mrb[30].mxu0 %vm292_vm0, %v261_v20  ;;  %1253 = vmatmul.mubr.msk.f32.gmra.mrb[30].mxu1 %vm292_vm0, %v261_v20 }
  0x4e   : > { %549 = vmatprep.mubr.f32.mxu0 %v1291_v3  ;;  %937 = vmatprep.mubr.f32.mxu1 %v1291_v3 }
  0x51   : > { %1222 = vmatmul.mubr.msk.f32.gmra.mrb[32].mxu0 %vm292_vm0, %v262_v21  ;;  %1254 = vmatmul.mubr.msk.f32.gmra.mrb[32].mxu1 %vm292_vm0, %v262_v21 }
  0x52   : > { %555 = vmatprep.mubr.f32.mxu0 %v1291_v3  ;;  %943 = vmatprep.mubr.f32.mxu1 %v1291_v3 }
  0x55   : > { %1223 = vmatmul.mubr.msk.f32.gmra.mrb[34].mxu0 %vm292_vm0, %v263_v22  ;;  %1255 = vmatmul.mubr.msk.f32.gmra.mrb[34].mxu1 %vm292_vm0, %v263_v22 }
  0x56   : > { %561 = vmatprep.mubr.f32.mxu0 %v1291_v3  ;;  %949 = vmatprep.mubr.f32.mxu1 %v1291_v3 }
  0x59   : > { %1224 = vmatmul.mubr.msk.f32.gmra.mrb[36].mxu0 %vm292_vm0, %v264_v23  ;;  %1256 = vmatmul.mubr.msk.f32.gmra.mrb[36].mxu1 %vm292_vm0, %v264_v23 }
  0x5a   : > { %567 = vmatprep.mubr.f32.mxu0 %v1291_v3  ;;  %955 = vmatprep.mubr.f32.mxu1 %v1291_v3 }
  0x5d   : > { %1225 = vmatmul.mubr.msk.f32.gmra.mrb[38].mxu0 %vm292_vm0, %v265_v24  ;;  %1257 = vmatmul.mubr.msk.f32.gmra.mrb[38].mxu1 %vm292_vm0, %v265_v24 }
  0x5e   : > { %573 = vmatprep.mubr.f32.mxu0 %v1291_v3  ;;  %961 = vmatprep.mubr.f32.mxu1 %v1291_v3 }
  0x61   : > { %1226 = vmatmul.mubr.msk.f32.gmra.mrb[40].mxu0 %vm292_vm0, %v266_v25  ;;  %1258 = vmatmul.mubr.msk.f32.gmra.mrb[40].mxu1 %vm292_vm0, %v266_v25 }
  0x62   : > { %579 = vmatprep.mubr.f32.mxu0 %v1291_v3  ;;  %967 = vmatprep.mubr.f32.mxu1 %v1291_v3 }
  0x65   : > { %1227 = vmatmul.mubr.msk.f32.gmra.mrb[42].mxu0 %vm292_vm0, %v267_v26  ;;  %1259 = vmatmul.mubr.msk.f32.gmra.mrb[42].mxu1 %vm292_vm0, %v267_v26 }
  0x66   : > { %585 = vmatprep.mubr.f32.mxu0 %v1291_v3  ;;  %973 = vmatprep.mubr.f32.mxu1 %v1291_v3 }
  0x69   : > { %1228 = vmatmul.mubr.msk.f32.gmra.mrb[44].mxu0 %vm292_vm0, %v268_v27  ;;  %1260 = vmatmul.mubr.msk.f32.gmra.mrb[44].mxu1 %vm292_vm0, %v268_v27 }
  0x6a   : > { %591 = vmatprep.mubr.f32.mxu0 %v1291_v3  ;;  %979 = vmatprep.mubr.f32.mxu1 %v1291_v3 }
  0x6d   : > { %1229 = vmatmul.mubr.msk.f32.gmra.mrb[46].mxu0 %vm292_vm0, %v269_v28  ;;  %1261 = vmatmul.mubr.msk.f32.gmra.mrb[46].mxu1 %vm292_vm0, %v269_v28 }
  0x6e   : > { %597 = vmatprep.mubr.f32.mxu0 %v1291_v3  ;;  %985 = vmatprep.mubr.f32.mxu1 %v1291_v3 }
  0x71   : > { %1230 = vmatmul.mubr.msk.f32.gmra.mrb[48].mxu0 %vm292_vm0, %v270_v29  ;;  %1262 = vmatmul.mubr.msk.f32.gmra.mrb[48].mxu1 %vm292_vm0, %v270_v29 }
  0x72   : > { %603 = vmatprep.mubr.f32.mxu0 %v1291_v3  ;;  %991 = vmatprep.mubr.f32.mxu1 %v1291_v3 }
  0x75   : > { %1231 = vmatmul.mubr.msk.f32.gmra.mrb[50].mxu0 %vm292_vm0, %v271_v30  ;;  %1263 = vmatmul.mubr.msk.f32.gmra.mrb[50].mxu1 %vm292_vm0, %v271_v30 }
  0x76   : > { %609 = vmatprep.mubr.f32.mxu0 %v1291_v3  ;;  %997 = vmatprep.mubr.f32.mxu1 %v1291_v3 }
  0x79   : > { %1232 = vmatmul.mubr.msk.f32.gmra.mrb[52].mxu0 %vm292_vm0, %v272_v31  ;;  %1264 = vmatmul.mubr.msk.f32.gmra.mrb[52].mxu1 %vm292_vm0, %v272_v31 }
  0x7a   : > { %615 = vmatprep.mubr.f32.mxu0 %v1291_v3  ;;  %1003 = vmatprep.mubr.f32.mxu1 %v1291_v3 }
  0x7d   : > { %1233 = vmatmul.mubr.msk.f32.gmra.mrb[54].mxu0 %vm292_vm0, %v273_v32  ;;  %1265 = vmatmul.mubr.msk.f32.gmra.mrb[54].mxu1 %vm292_vm0, %v273_v32 }
  0x7e   : > { %621 = vmatprep.mubr.f32.mxu0 %v1291_v3  ;;  %1009 = vmatprep.mubr.f32.mxu1 %v1291_v3 }
  0x81   : > { %1234 = vmatmul.mubr.msk.f32.gmra.mrb[56].mxu0 %vm292_vm0, %v274_v33  ;;  %1266 = vmatmul.mubr.msk.f32.gmra.mrb[56].mxu1 %vm292_vm0, %v274_v33 }
  0x82   : > { %627 = vmatprep.mubr.f32.mxu0 %v1291_v3  ;;  %1015 = vmatprep.mubr.f32.mxu1 %v1291_v3 }
  0x85   : > { %1235 = vmatmul.mubr.msk.f32.gmra.mrb[58].mxu0 %vm292_vm0, %v275_v34  ;;  %1267 = vmatmul.mubr.msk.f32.gmra.mrb[58].mxu1 %vm292_vm0, %v275_v34 }
  0x86   : > { %633 = vmatprep.mubr.f32.mxu0 %v1291_v3  ;;  %1021 = vmatprep.mubr.f32.mxu1 %v1291_v3 }
  0x89   : > { %1236 = vmatmul.mubr.msk.f32.gmra.mrb[60].mxu0 %vm292_vm0, %v276_v35  ;;  %1268 = vmatmul.mubr.msk.f32.gmra.mrb[60].mxu1 %vm292_vm0, %v276_v35 }
  0x8a   : > { %639 = vmatprep.mubr.f32.mxu0 %v1291_v3  ;;  %1027 = vmatprep.mubr.f32.mxu1 %v1291_v3 }
  0x8d   : > { %1237 = vmatmul.mubr.msk.f32.gmra.mrb[62].mxu0 %vm292_vm0, %v277_v36  ;;  %1269 = vmatmul.mubr.msk.f32.gmra.mrb[62].mxu1 %vm292_vm0, %v277_v36 }
  0xe4   : > { %v455_v44 = vpop.f32.mrb[0].mxu0  ;;  %v843_v45 = vpop.f32.mrb[0].mxu1 }
  0xe5   : > { %v456_v46 = vadd.f32 %v455_v44, %v1514_v42  ;;  %v457_v47 = vpop.f32.mrb[1].mxu0  ;;  %1034 = vst [vmem:[%s1521_s13] sm:$0xff] %v843_v45  ;;  %v845_v48 = vpop.f32.mrb[1].mxu1 }
  0xe6   : > { %v458_v49 = vadd.f32 %v457_v47, %v1516_v43  ;;  %1036 = vst.msk [vmem:[%s1521_s13 + $0x8] sm:$0xff] %vm1035_vm1, %v845_v48 }
  0xe7   : > { %v646_v50 = vmax.f32 %v456_v46, 0.0 }
  0xe8   : > { %v647_v51 = vmax.f32 %v458_v49, 0.0  ;;  %v461_v52 = vpop.f32.mrb[2].mxu0  ;;  %v849_v53 = vpop.f32.mrb[2].mxu1 }
  0xe9   : > { %710 = vst [vmem:[%s1528_s16] sm:$0xff] %v646_v50  ;;  %v462_v54 = vadd.f32 %v461_v52, %v1514_v42  ;;  %v463_v55 = vpop.f32.mrb[3].mxu0  ;;  %1037 = vst [vmem:[%s1521_s13 + $0x10] sm:$0xff] %v849_v53  ;;  %v851_v56 = vpop.f32.mrb[3].mxu1 }
  0xea   : > { %712 = vst.msk [vmem:[%s1528_s16 + $0x8] sm:$0xff] %vm711_vm2, %v647_v51  ;;  %v464_v57 = vadd.f32 %v463_v55, %v1516_v43 }
  0xeb   : > { %1038 = vst.msk [vmem:[%s1521_s13 + $0x18] sm:$0xff] %vm1035_vm1, %v851_v56  ;;  %v648_v58 = vmax.f32 %v462_v54, 0.0 }
  0xec   : > { %v649_v59 = vmax.f32 %v464_v57, 0.0  ;;  %v467_v60 = vpop.f32.mrb[4].mxu0  ;;  %v855_v61 = vpop.f32.mrb[4].mxu1 }
  0xed   : > { %713 = vst [vmem:[%s1528_s16 + $0x10] sm:$0xff] %v648_v58  ;;  %v468_v62 = vadd.f32 %v467_v60, %v1514_v42  ;;  %v469_v63 = vpop.f32.mrb[5].mxu0  ;;  %1039 = vst [vmem:[%s1521_s13 + $0x20] sm:$0xff] %v855_v61  ;;  %v857_v0 = vpop.f32.mrb[5].mxu1 }
  0xee   : > { %714 = vst.msk [vmem:[%s1528_s16 + $0x18] sm:$0xff] %vm711_vm2, %v649_v59  ;;  %v470_v1 = vadd.f32 %v469_v63, %v1516_v43 }
  0xef   : > { %1040 = vst.msk [vmem:[%s1521_s13 + $0x28] sm:$0xff] %vm1035_vm1, %v857_v0  ;;  %v650_v2 = vmax.f32 %v468_v62, 0.0 }
  0xf0   : > { %v651_v3 = vmax.f32 %v470_v1, 0.0  ;;  %v473_v4 = vpop.f32.mrb[6].mxu0  ;;  %v861_v5 = vpop.f32.mrb[6].mxu1 }
  0xf1   : > { %715 = vst [vmem:[%s1528_s16 + $0x20] sm:$0xff] %v650_v2  ;;  %v474_v6 = vadd.f32 %v473_v4, %v1514_v42  ;;  %v475_v7 = vpop.f32.mrb[7].mxu0  ;;  %1041 = vst [vmem:[%s1521_s13 + $0x30] sm:$0xff] %v861_v5  ;;  %v863_v8 = vpop.f32.mrb[7].mxu1 }
  0xf2   : > { %716 = vst.msk [vmem:[%s1528_s16 + $0x28] sm:$0xff] %vm711_vm2, %v651_v3  ;;  %v476_v9 = vadd.f32 %v475_v7, %v1516_v43 }
  0xf3   : > { %1042 = vst.msk [vmem:[%s1521_s13 + $0x38] sm:$0xff] %vm1035_vm1, %v863_v8  ;;  %v652_v10 = vmax.f32 %v474_v6, 0.0 }
  0xf4   : > { %v653_v11 = vmax.f32 %v476_v9, 0.0  ;;  %v479_v12 = vpop.f32.mrb[8].mxu0  ;;  %v867_v13 = vpop.f32.mrb[8].mxu1 }
  0xf5   : > { %717 = vst [vmem:[%s1528_s16 + $0x30] sm:$0xff] %v652_v10  ;;  %v480_v14 = vadd.f32 %v479_v12, %v1514_v42  ;;  %v481_v15 = vpop.f32.mrb[9].mxu0  ;;  %1043 = vst [vmem:[%s1521_s13 + $0x40] sm:$0xff] %v867_v13  ;;  %v869_v16 = vpop.f32.mrb[9].mxu1 }
  0xf6   : > { %718 = vst.msk [vmem:[%s1528_s16 + $0x38] sm:$0xff] %vm711_vm2, %v653_v11  ;;  %v482_v17 = vadd.f32 %v481_v15, %v1516_v43 }
  0xf7   : > { %1044 = vst.msk [vmem:[%s1521_s13 + $0x48] sm:$0xff] %vm1035_vm1, %v869_v16  ;;  %v654_v18 = vmax.f32 %v480_v14, 0.0 }
  0xf8   : > { %v655_v19 = vmax.f32 %v482_v17, 0.0  ;;  %v485_v20 = vpop.f32.mrb[10].mxu0  ;;  %v873_v21 = vpop.f32.mrb[10].mxu1 }
  0xf9   : > { %719 = vst [vmem:[%s1528_s16 + $0x40] sm:$0xff] %v654_v18  ;;  %v486_v22 = vadd.f32 %v485_v20, %v1514_v42  ;;  %v487_v23 = vpop.f32.mrb[11].mxu0  ;;  %1045 = vst [vmem:[%s1521_s13 + $0x50] sm:$0xff] %v873_v21  ;;  %v875_v24 = vpop.f32.mrb[11].mxu1 }
  0xfa   : > { %720 = vst.msk [vmem:[%s1528_s16 + $0x48] sm:$0xff] %vm711_vm2, %v655_v19  ;;  %v488_v25 = vadd.f32 %v487_v23, %v1516_v43 }
  0xfb   : > { %1046 = vst.msk [vmem:[%s1521_s13 + $0x58] sm:$0xff] %vm1035_vm1, %v875_v24  ;;  %v656_v26 = vmax.f32 %v486_v22, 0.0 }
  0xfc   : > { %v657_v27 = vmax.f32 %v488_v25, 0.0  ;;  %v491_v28 = vpop.f32.mrb[12].mxu0  ;;  %v879_v29 = vpop.f32.mrb[12].mxu1 }
  0xfd   : > { %721 = vst [vmem:[%s1528_s16 + $0x50] sm:$0xff] %v656_v26  ;;  %v492_v30 = vadd.f32 %v491_v28, %v1514_v42  ;;  %v493_v31 = vpop.f32.mrb[13].mxu0  ;;  %1047 = vst [vmem:[%s1521_s13 + $0x60] sm:$0xff] %v879_v29  ;;  %v881_v32 = vpop.f32.mrb[13].mxu1 }
  0xfe   : > { %722 = vst.msk [vmem:[%s1528_s16 + $0x58] sm:$0xff] %vm711_vm2, %v657_v27  ;;  %v494_v33 = vadd.f32 %v493_v31, %v1516_v43 }
  0xff   : > { %1048 = vst.msk [vmem:[%s1521_s13 + $0x68] sm:$0xff] %vm1035_vm1, %v881_v32  ;;  %v658_v34 = vmax.f32 %v492_v30, 0.0 }
 0x100   : > { %v659_v35 = vmax.f32 %v494_v33, 0.0  ;;  %v497_v36 = vpop.f32.mrb[14].mxu0  ;;  %v885_v37 = vpop.f32.mrb[14].mxu1 }
 0x101   : > { %723 = vst [vmem:[%s1528_s16 + $0x60] sm:$0xff] %v658_v34  ;;  %v498_v38 = vadd.f32 %v497_v36, %v1514_v42  ;;  %v499_v39 = vpop.f32.mrb[15].mxu0  ;;  %1049 = vst [vmem:[%s1521_s13 + $0x70] sm:$0xff] %v885_v37  ;;  %v887_v40 = vpop.f32.mrb[15].mxu1 }
 0x102   : > { %724 = vst.msk [vmem:[%s1528_s16 + $0x68] sm:$0xff] %vm711_vm2, %v659_v35  ;;  %v500_v41 = vadd.f32 %v499_v39, %v1516_v43 }
 0x103   : > { %1050 = vst.msk [vmem:[%s1521_s13 + $0x78] sm:$0xff] %vm1035_vm1, %v887_v40  ;;  %v660_v44 = vmax.f32 %v498_v38, 0.0 }
 0x104   : > { %v661_v45 = vmax.f32 %v500_v41, 0.0  ;;  %v503_v46 = vpop.f32.mrb[16].mxu0  ;;  %v891_v47 = vpop.f32.mrb[16].mxu1 }
 0x105   : > { %725 = vst [vmem:[%s1528_s16 + $0x70] sm:$0xff] %v660_v44  ;;  %v504_v48 = vadd.f32 %v503_v46, %v1514_v42  ;;  %v505_v49 = vpop.f32.mrb[17].mxu0  ;;  %1051 = vst [vmem:[%s1521_s13 + $0x80] sm:$0xff] %v891_v47  ;;  %v893_v50 = vpop.f32.mrb[17].mxu1 }
 0x106   : > { %726 = vst.msk [vmem:[%s1528_s16 + $0x78] sm:$0xff] %vm711_vm2, %v661_v45  ;;  %v506_v51 = vadd.f32 %v505_v49, %v1516_v43 }
 0x107   : > { %1052 = vst.msk [vmem:[%s1521_s13 + $0x88] sm:$0xff] %vm1035_vm1, %v893_v50  ;;  %v662_v52 = vmax.f32 %v504_v48, 0.0 }
 0x108   : > { %v663_v53 = vmax.f32 %v506_v51, 0.0  ;;  %v509_v54 = vpop.f32.mrb[18].mxu0  ;;  %v897_v55 = vpop.f32.mrb[18].mxu1 }
 0x109   : > { %727 = vst [vmem:[%s1528_s16 + $0x80] sm:$0xff] %v662_v52  ;;  %v510_v56 = vadd.f32 %v509_v54, %v1514_v42  ;;  %v511_v57 = vpop.f32.mrb[19].mxu0  ;;  %1053 = vst [vmem:[%s1521_s13 + $0x90] sm:$0xff] %v897_v55  ;;  %v899_v58 = vpop.f32.mrb[19].mxu1 }
 0x10a   : > { %728 = vst.msk [vmem:[%s1528_s16 + $0x88] sm:$0xff] %vm711_vm2, %v663_v53  ;;  %v512_v59 = vadd.f32 %v511_v57, %v1516_v43 }
 0x10b   : > { %1054 = vst.msk [vmem:[%s1521_s13 + $0x98] sm:$0xff] %vm1035_vm1, %v899_v58  ;;  %v664_v60 = vmax.f32 %v510_v56, 0.0 }
 0x10c   : > { %v665_v61 = vmax.f32 %v512_v59, 0.0  ;;  %v515_v62 = vpop.f32.mrb[20].mxu0  ;;  %v903_v63 = vpop.f32.mrb[20].mxu1 }
 0x10d   : > { %729 = vst [vmem:[%s1528_s16 + $0x90] sm:$0xff] %v664_v60  ;;  %v516_v0 = vadd.f32 %v515_v62, %v1514_v42  ;;  %v517_v1 = vpop.f32.mrb[21].mxu0  ;;  %1055 = vst [vmem:[%s1521_s13 + $0xa0] sm:$0xff] %v903_v63  ;;  %v905_v2 = vpop.f32.mrb[21].mxu1 }
 0x10e   : > { %730 = vst.msk [vmem:[%s1528_s16 + $0x98] sm:$0xff] %vm711_vm2, %v665_v61  ;;  %v518_v3 = vadd.f32 %v517_v1, %v1516_v43 }
 0x10f   : > { %1056 = vst.msk [vmem:[%s1521_s13 + $0xa8] sm:$0xff] %vm1035_vm1, %v905_v2  ;;  %v666_v4 = vmax.f32 %v516_v0, 0.0 }
 0x110   : > { %v667_v5 = vmax.f32 %v518_v3, 0.0  ;;  %v521_v6 = vpop.f32.mrb[22].mxu0  ;;  %v909_v7 = vpop.f32.mrb[22].mxu1 }
 0x111   : > { %731 = vst [vmem:[%s1528_s16 + $0xa0] sm:$0xff] %v666_v4  ;;  %v522_v8 = vadd.f32 %v521_v6, %v1514_v42  ;;  %v523_v9 = vpop.f32.mrb[23].mxu0  ;;  %1057 = vst [vmem:[%s1521_s13 + $0xb0] sm:$0xff] %v909_v7  ;;  %v911_v10 = vpop.f32.mrb[23].mxu1 }
 0x112   : > { %732 = vst.msk [vmem:[%s1528_s16 + $0xa8] sm:$0xff] %vm711_vm2, %v667_v5  ;;  %v524_v11 = vadd.f32 %v523_v9, %v1516_v43 }
 0x113   : > { %1058 = vst.msk [vmem:[%s1521_s13 + $0xb8] sm:$0xff] %vm1035_vm1, %v911_v10  ;;  %v668_v12 = vmax.f32 %v522_v8, 0.0 }
 0x114   : > { %v669_v13 = vmax.f32 %v524_v11, 0.0  ;;  %v527_v14 = vpop.f32.mrb[24].mxu0  ;;  %v915_v15 = vpop.f32.mrb[24].mxu1 }
 0x115   : > { %733 = vst [vmem:[%s1528_s16 + $0xb0] sm:$0xff] %v668_v12  ;;  %v528_v16 = vadd.f32 %v527_v14, %v1514_v42  ;;  %v529_v17 = vpop.f32.mrb[25].mxu0  ;;  %1059 = vst [vmem:[%s1521_s13 + $0xc0] sm:$0xff] %v915_v15  ;;  %v917_v18 = vpop.f32.mrb[25].mxu1 }
 0x116   : > { %734 = vst.msk [vmem:[%s1528_s16 + $0xb8] sm:$0xff] %vm711_vm2, %v669_v13  ;;  %v530_v19 = vadd.f32 %v529_v17, %v1516_v43 }
 0x117   : > { %1060 = vst.msk [vmem:[%s1521_s13 + $0xc8] sm:$0xff] %vm1035_vm1, %v917_v18  ;;  %v670_v20 = vmax.f32 %v528_v16, 0.0 }
 0x118   : > { %v671_v21 = vmax.f32 %v530_v19, 0.0  ;;  %v533_v22 = vpop.f32.mrb[26].mxu0  ;;  %v921_v23 = vpop.f32.mrb[26].mxu1 }
 0x119   : > { %735 = vst [vmem:[%s1528_s16 + $0xc0] sm:$0xff] %v670_v20  ;;  %v534_v24 = vadd.f32 %v533_v22, %v1514_v42  ;;  %v535_v25 = vpop.f32.mrb[27].mxu0  ;;  %1061 = vst [vmem:[%s1521_s13 + $0xd0] sm:$0xff] %v921_v23  ;;  %v923_v26 = vpop.f32.mrb[27].mxu1 }
 0x11a   : > { %736 = vst.msk [vmem:[%s1528_s16 + $0xc8] sm:$0xff] %vm711_vm2, %v671_v21  ;;  %v536_v27 = vadd.f32 %v535_v25, %v1516_v43 }
 0x11b   : > { %1062 = vst.msk [vmem:[%s1521_s13 + $0xd8] sm:$0xff] %vm1035_vm1, %v923_v26  ;;  %v672_v28 = vmax.f32 %v534_v24, 0.0 }
 0x11c   : > { %v673_v29 = vmax.f32 %v536_v27, 0.0  ;;  %v539_v30 = vpop.f32.mrb[28].mxu0  ;;  %v927_v31 = vpop.f32.mrb[28].mxu1 }
 0x11d   : > { %737 = vst [vmem:[%s1528_s16 + $0xd0] sm:$0xff] %v672_v28  ;;  %v540_v32 = vadd.f32 %v539_v30, %v1514_v42  ;;  %v541_v33 = vpop.f32.mrb[29].mxu0  ;;  %1063 = vst [vmem:[%s1521_s13 + $0xe0] sm:$0xff] %v927_v31  ;;  %v929_v34 = vpop.f32.mrb[29].mxu1 }
 0x11e   : > { %738 = vst.msk [vmem:[%s1528_s16 + $0xd8] sm:$0xff] %vm711_vm2, %v673_v29  ;;  %v542_v35 = vadd.f32 %v541_v33, %v1516_v43 }
 0x11f   : > { %1064 = vst.msk [vmem:[%s1521_s13 + $0xe8] sm:$0xff] %vm1035_vm1, %v929_v34  ;;  %v674_v36 = vmax.f32 %v540_v32, 0.0 }
 0x120   : > { %v675_v37 = vmax.f32 %v542_v35, 0.0  ;;  %v545_v38 = vpop.f32.mrb[30].mxu0  ;;  %v933_v39 = vpop.f32.mrb[30].mxu1 }
 0x121   : > { %739 = vst [vmem:[%s1528_s16 + $0xe0] sm:$0xff] %v674_v36  ;;  %v546_v40 = vadd.f32 %v545_v38, %v1514_v42  ;;  %v547_v41 = vpop.f32.mrb[31].mxu0  ;;  %1065 = vst [vmem:[%s1521_s13 + $0xf0] sm:$0xff] %v933_v39  ;;  %v935_v44 = vpop.f32.mrb[31].mxu1 }
 0x122   : > { %740 = vst.msk [vmem:[%s1528_s16 + $0xe8] sm:$0xff] %vm711_vm2, %v675_v37  ;;  %v548_v45 = vadd.f32 %v547_v41, %v1516_v43 }
 0x123   : > { %1066 = vst.msk [vmem:[%s1521_s13 + $0xf8] sm:$0xff] %vm1035_vm1, %v935_v44  ;;  %v676_v46 = vmax.f32 %v546_v40, 0.0 }
 0x124   : > { %v677_v47 = vmax.f32 %v548_v45, 0.0  ;;  %v551_v48 = vpop.f32.mrb[32].mxu0  ;;  %v939_v49 = vpop.f32.mrb[32].mxu1 }
 0x125   : > { %741 = vst [vmem:[%s1528_s16 + $0xf0] sm:$0xff] %v676_v46  ;;  %v552_v50 = vadd.f32 %v551_v48, %v1514_v42  ;;  %v553_v51 = vpop.f32.mrb[33].mxu0  ;;  %1067 = vst [vmem:[%s1521_s13 + $0x100] sm:$0xff] %v939_v49  ;;  %v941_v52 = vpop.f32.mrb[33].mxu1 }
 0x126   : > { %742 = vst.msk [vmem:[%s1528_s16 + $0xf8] sm:$0xff] %vm711_vm2, %v677_v47  ;;  %v554_v53 = vadd.f32 %v553_v51, %v1516_v43 }
 0x127   : > { %1068 = vst.msk [vmem:[%s1521_s13 + $0x108] sm:$0xff] %vm1035_vm1, %v941_v52  ;;  %v678_v54 = vmax.f32 %v552_v50, 0.0 }
 0x128   : > { %v679_v55 = vmax.f32 %v554_v53, 0.0  ;;  %v557_v56 = vpop.f32.mrb[34].mxu0  ;;  %v945_v57 = vpop.f32.mrb[34].mxu1 }
 0x129   : > { %743 = vst [vmem:[%s1528_s16 + $0x100] sm:$0xff] %v678_v54  ;;  %v558_v58 = vadd.f32 %v557_v56, %v1514_v42  ;;  %v559_v59 = vpop.f32.mrb[35].mxu0  ;;  %1069 = vst [vmem:[%s1521_s13 + $0x110] sm:$0xff] %v945_v57  ;;  %v947_v60 = vpop.f32.mrb[35].mxu1 }
 0x12a   : > { %744 = vst.msk [vmem:[%s1528_s16 + $0x108] sm:$0xff] %vm711_vm2, %v679_v55  ;;  %v560_v61 = vadd.f32 %v559_v59, %v1516_v43 }
 0x12b   : > { %1070 = vst.msk [vmem:[%s1521_s13 + $0x118] sm:$0xff] %vm1035_vm1, %v947_v60  ;;  %v680_v62 = vmax.f32 %v558_v58, 0.0 }
 0x12c   : > { %v681_v63 = vmax.f32 %v560_v61, 0.0  ;;  %v563_v0 = vpop.f32.mrb[36].mxu0  ;;  %v951_v1 = vpop.f32.mrb[36].mxu1 }
 0x12d   : > { %745 = vst [vmem:[%s1528_s16 + $0x110] sm:$0xff] %v680_v62  ;;  %v564_v2 = vadd.f32 %v563_v0, %v1514_v42  ;;  %v565_v3 = vpop.f32.mrb[37].mxu0  ;;  %1071 = vst [vmem:[%s1521_s13 + $0x120] sm:$0xff] %v951_v1  ;;  %v953_v4 = vpop.f32.mrb[37].mxu1 }
 0x12e   : > { %746 = vst.msk [vmem:[%s1528_s16 + $0x118] sm:$0xff] %vm711_vm2, %v681_v63  ;;  %v566_v5 = vadd.f32 %v565_v3, %v1516_v43 }
 0x12f   : > { %1072 = vst.msk [vmem:[%s1521_s13 + $0x128] sm:$0xff] %vm1035_vm1, %v953_v4  ;;  %v682_v6 = vmax.f32 %v564_v2, 0.0 }
 0x130   : > { %v683_v7 = vmax.f32 %v566_v5, 0.0  ;;  %v569_v8 = vpop.f32.mrb[38].mxu0  ;;  %v957_v9 = vpop.f32.mrb[38].mxu1 }
 0x131   : > { %747 = vst [vmem:[%s1528_s16 + $0x120] sm:$0xff] %v682_v6  ;;  %v570_v10 = vadd.f32 %v569_v8, %v1514_v42  ;;  %v571_v11 = vpop.f32.mrb[39].mxu0  ;;  %1073 = vst [vmem:[%s1521_s13 + $0x130] sm:$0xff] %v957_v9  ;;  %v959_v12 = vpop.f32.mrb[39].mxu1 }
 0x132   : > { %748 = vst.msk [vmem:[%s1528_s16 + $0x128] sm:$0xff] %vm711_vm2, %v683_v7  ;;  %v572_v13 = vadd.f32 %v571_v11, %v1516_v43 }
 0x133   : > { %1074 = vst.msk [vmem:[%s1521_s13 + $0x138] sm:$0xff] %vm1035_vm1, %v959_v12  ;;  %v684_v14 = vmax.f32 %v570_v10, 0.0 }
 0x134   : > { %v685_v15 = vmax.f32 %v572_v13, 0.0  ;;  %v575_v16 = vpop.f32.mrb[40].mxu0  ;;  %v963_v17 = vpop.f32.mrb[40].mxu1 }
 0x135   : > { %749 = vst [vmem:[%s1528_s16 + $0x130] sm:$0xff] %v684_v14  ;;  %v576_v18 = vadd.f32 %v575_v16, %v1514_v42  ;;  %v577_v19 = vpop.f32.mrb[41].mxu0  ;;  %1075 = vst [vmem:[%s1521_s13 + $0x140] sm:$0xff] %v963_v17  ;;  %v965_v20 = vpop.f32.mrb[41].mxu1 }
 0x136   : > { %750 = vst.msk [vmem:[%s1528_s16 + $0x138] sm:$0xff] %vm711_vm2, %v685_v15  ;;  %v578_v21 = vadd.f32 %v577_v19, %v1516_v43 }
 0x137   : > { %1076 = vst.msk [vmem:[%s1521_s13 + $0x148] sm:$0xff] %vm1035_vm1, %v965_v20  ;;  %v686_v22 = vmax.f32 %v576_v18, 0.0 }
 0x138   : > { %v687_v23 = vmax.f32 %v578_v21, 0.0  ;;  %v581_v24 = vpop.f32.mrb[42].mxu0  ;;  %v969_v25 = vpop.f32.mrb[42].mxu1 }
 0x139   : > { %751 = vst [vmem:[%s1528_s16 + $0x140] sm:$0xff] %v686_v22  ;;  %v582_v26 = vadd.f32 %v581_v24, %v1514_v42  ;;  %v583_v27 = vpop.f32.mrb[43].mxu0  ;;  %1077 = vst [vmem:[%s1521_s13 + $0x150] sm:$0xff] %v969_v25  ;;  %v971_v28 = vpop.f32.mrb[43].mxu1 }
 0x13a   : > { %752 = vst.msk [vmem:[%s1528_s16 + $0x148] sm:$0xff] %vm711_vm2, %v687_v23  ;;  %v584_v29 = vadd.f32 %v583_v27, %v1516_v43 }
 0x13b   : > { %1078 = vst.msk [vmem:[%s1521_s13 + $0x158] sm:$0xff] %vm1035_vm1, %v971_v28  ;;  %v688_v30 = vmax.f32 %v582_v26, 0.0 }
 0x13c   : > { %v689_v31 = vmax.f32 %v584_v29, 0.0  ;;  %v587_v32 = vpop.f32.mrb[44].mxu0  ;;  %v975_v33 = vpop.f32.mrb[44].mxu1 }
 0x13d   : > { %753 = vst [vmem:[%s1528_s16 + $0x150] sm:$0xff] %v688_v30  ;;  %v588_v34 = vadd.f32 %v587_v32, %v1514_v42  ;;  %v589_v35 = vpop.f32.mrb[45].mxu0  ;;  %1079 = vst [vmem:[%s1521_s13 + $0x160] sm:$0xff] %v975_v33  ;;  %v977_v36 = vpop.f32.mrb[45].mxu1 }
 0x13e   : > { %754 = vst.msk [vmem:[%s1528_s16 + $0x158] sm:$0xff] %vm711_vm2, %v689_v31  ;;  %v590_v37 = vadd.f32 %v589_v35, %v1516_v43 }
 0x13f   : > { %1080 = vst.msk [vmem:[%s1521_s13 + $0x168] sm:$0xff] %vm1035_vm1, %v977_v36  ;;  %v690_v38 = vmax.f32 %v588_v34, 0.0 }
 0x140   : > { %v691_v39 = vmax.f32 %v590_v37, 0.0  ;;  %v593_v40 = vpop.f32.mrb[46].mxu0  ;;  %v981_v41 = vpop.f32.mrb[46].mxu1 }
 0x141   : > { %755 = vst [vmem:[%s1528_s16 + $0x160] sm:$0xff] %v690_v38  ;;  %v594_v44 = vadd.f32 %v593_v40, %v1514_v42  ;;  %v595_v45 = vpop.f32.mrb[47].mxu0  ;;  %1081 = vst [vmem:[%s1521_s13 + $0x170] sm:$0xff] %v981_v41  ;;  %v983_v46 = vpop.f32.mrb[47].mxu1 }
 0x142   : > { %756 = vst.msk [vmem:[%s1528_s16 + $0x168] sm:$0xff] %vm711_vm2, %v691_v39  ;;  %v596_v47 = vadd.f32 %v595_v45, %v1516_v43 }
 0x143   : > { %1082 = vst.msk [vmem:[%s1521_s13 + $0x178] sm:$0xff] %vm1035_vm1, %v983_v46  ;;  %v692_v48 = vmax.f32 %v594_v44, 0.0 }
 0x144   : > { %v693_v49 = vmax.f32 %v596_v47, 0.0  ;;  %v599_v50 = vpop.f32.mrb[48].mxu0  ;;  %v987_v51 = vpop.f32.mrb[48].mxu1 }
 0x145   : > { %757 = vst [vmem:[%s1528_s16 + $0x170] sm:$0xff] %v692_v48  ;;  %v600_v52 = vadd.f32 %v599_v50, %v1514_v42  ;;  %v601_v53 = vpop.f32.mrb[49].mxu0  ;;  %1083 = vst [vmem:[%s1521_s13 + $0x180] sm:$0xff] %v987_v51  ;;  %v989_v54 = vpop.f32.mrb[49].mxu1 }
 0x146   : > { %758 = vst.msk [vmem:[%s1528_s16 + $0x178] sm:$0xff] %vm711_vm2, %v693_v49  ;;  %v602_v55 = vadd.f32 %v601_v53, %v1516_v43 }
 0x147   : > { %1084 = vst.msk [vmem:[%s1521_s13 + $0x188] sm:$0xff] %vm1035_vm1, %v989_v54  ;;  %v694_v56 = vmax.f32 %v600_v52, 0.0 }
 0x148   : > { %v695_v57 = vmax.f32 %v602_v55, 0.0  ;;  %v605_v58 = vpop.f32.mrb[50].mxu0  ;;  %v993_v59 = vpop.f32.mrb[50].mxu1 }
 0x149   : > { %759 = vst [vmem:[%s1528_s16 + $0x180] sm:$0xff] %v694_v56  ;;  %v606_v60 = vadd.f32 %v605_v58, %v1514_v42  ;;  %v607_v61 = vpop.f32.mrb[51].mxu0  ;;  %1085 = vst [vmem:[%s1521_s13 + $0x190] sm:$0xff] %v993_v59  ;;  %v995_v62 = vpop.f32.mrb[51].mxu1 }
 0x14a   : > { %760 = vst.msk [vmem:[%s1528_s16 + $0x188] sm:$0xff] %vm711_vm2, %v695_v57  ;;  %v608_v63 = vadd.f32 %v607_v61, %v1516_v43 }
 0x14b   : > { %1086 = vst.msk [vmem:[%s1521_s13 + $0x198] sm:$0xff] %vm1035_vm1, %v995_v62  ;;  %v696_v0 = vmax.f32 %v606_v60, 0.0 }
 0x14c   : > { %v697_v1 = vmax.f32 %v608_v63, 0.0  ;;  %v611_v2 = vpop.f32.mrb[52].mxu0  ;;  %v999_v3 = vpop.f32.mrb[52].mxu1 }
 0x14d   : > { %761 = vst [vmem:[%s1528_s16 + $0x190] sm:$0xff] %v696_v0  ;;  %v612_v4 = vadd.f32 %v611_v2, %v1514_v42  ;;  %v613_v5 = vpop.f32.mrb[53].mxu0  ;;  %1087 = vst [vmem:[%s1521_s13 + $0x1a0] sm:$0xff] %v999_v3  ;;  %v1001_v6 = vpop.f32.mrb[53].mxu1 }
 0x14e   : > { %762 = vst.msk [vmem:[%s1528_s16 + $0x198] sm:$0xff] %vm711_vm2, %v697_v1  ;;  %v614_v7 = vadd.f32 %v613_v5, %v1516_v43 }
 0x14f   : > { %1088 = vst.msk [vmem:[%s1521_s13 + $0x1a8] sm:$0xff] %vm1035_vm1, %v1001_v6  ;;  %v698_v8 = vmax.f32 %v612_v4, 0.0 }
 0x150   : > { %v699_v9 = vmax.f32 %v614_v7, 0.0  ;;  %v617_v10 = vpop.f32.mrb[54].mxu0  ;;  %v1005_v11 = vpop.f32.mrb[54].mxu1 }
 0x151   : > { %763 = vst [vmem:[%s1528_s16 + $0x1a0] sm:$0xff] %v698_v8  ;;  %v618_v12 = vadd.f32 %v617_v10, %v1514_v42  ;;  %v619_v13 = vpop.f32.mrb[55].mxu0  ;;  %1089 = vst [vmem:[%s1521_s13 + $0x1b0] sm:$0xff] %v1005_v11  ;;  %v1007_v14 = vpop.f32.mrb[55].mxu1 }
 0x152   : > { %764 = vst.msk [vmem:[%s1528_s16 + $0x1a8] sm:$0xff] %vm711_vm2, %v699_v9  ;;  %v620_v15 = vadd.f32 %v619_v13, %v1516_v43 }
 0x153   : > { %1090 = vst.msk [vmem:[%s1521_s13 + $0x1b8] sm:$0xff] %vm1035_vm1, %v1007_v14  ;;  %v700_v16 = vmax.f32 %v618_v12, 0.0 }
 0x154   : > { %v701_v17 = vmax.f32 %v620_v15, 0.0  ;;  %v623_v18 = vpop.f32.mrb[56].mxu0  ;;  %v1011_v19 = vpop.f32.mrb[56].mxu1 }
 0x155   : > { %765 = vst [vmem:[%s1528_s16 + $0x1b0] sm:$0xff] %v700_v16  ;;  %v624_v20 = vadd.f32 %v623_v18, %v1514_v42  ;;  %v625_v21 = vpop.f32.mrb[57].mxu0  ;;  %1091 = vst [vmem:[%s1521_s13 + $0x1c0] sm:$0xff] %v1011_v19  ;;  %v1013_v22 = vpop.f32.mrb[57].mxu1 }
 0x156   : > { %766 = vst.msk [vmem:[%s1528_s16 + $0x1b8] sm:$0xff] %vm711_vm2, %v701_v17  ;;  %v626_v23 = vadd.f32 %v625_v21, %v1516_v43 }
 0x157   : > { %1092 = vst.msk [vmem:[%s1521_s13 + $0x1c8] sm:$0xff] %vm1035_vm1, %v1013_v22  ;;  %v702_v24 = vmax.f32 %v624_v20, 0.0 }
 0x158   : > { %v703_v25 = vmax.f32 %v626_v23, 0.0  ;;  %v629_v26 = vpop.f32.mrb[58].mxu0  ;;  %v1017_v27 = vpop.f32.mrb[58].mxu1 }
 0x159   : > { %767 = vst [vmem:[%s1528_s16 + $0x1c0] sm:$0xff] %v702_v24  ;;  %v630_v28 = vadd.f32 %v629_v26, %v1514_v42  ;;  %v631_v29 = vpop.f32.mrb[59].mxu0  ;;  %1093 = vst [vmem:[%s1521_s13 + $0x1d0] sm:$0xff] %v1017_v27  ;;  %v1019_v30 = vpop.f32.mrb[59].mxu1 }
 0x15a   : > { %768 = vst.msk [vmem:[%s1528_s16 + $0x1c8] sm:$0xff] %vm711_vm2, %v703_v25  ;;  %v632_v31 = vadd.f32 %v631_v29, %v1516_v43 }
 0x15b   : > { %1094 = vst.msk [vmem:[%s1521_s13 + $0x1d8] sm:$0xff] %vm1035_vm1, %v1019_v30  ;;  %v704_v32 = vmax.f32 %v630_v28, 0.0 }
 0x15c   : > { %v705_v33 = vmax.f32 %v632_v31, 0.0  ;;  %v635_v34 = vpop.f32.mrb[60].mxu0  ;;  %v1023_v35 = vpop.f32.mrb[60].mxu1 }
 0x15d   : > { %769 = vst [vmem:[%s1528_s16 + $0x1d0] sm:$0xff] %v704_v32  ;;  %v636_v36 = vadd.f32 %v635_v34, %v1514_v42  ;;  %v637_v37 = vpop.f32.mrb[61].mxu0  ;;  %1095 = vst [vmem:[%s1521_s13 + $0x1e0] sm:$0xff] %v1023_v35  ;;  %v1025_v38 = vpop.f32.mrb[61].mxu1 }
 0x15e   : > { %770 = vst.msk [vmem:[%s1528_s16 + $0x1d8] sm:$0xff] %vm711_vm2, %v705_v33  ;;  %v638_v39 = vadd.f32 %v637_v37, %v1516_v43 }
 0x15f   : > { %1096 = vst.msk [vmem:[%s1521_s13 + $0x1e8] sm:$0xff] %vm1035_vm1, %v1025_v38  ;;  %v706_v40 = vmax.f32 %v636_v36, 0.0 }
 0x160   : > { %v707_v41 = vmax.f32 %v638_v39, 0.0  ;;  %v641_v44 = vpop.f32.mrb[62].mxu0  ;;  %v1029_v45 = vpop.f32.mrb[62].mxu1 }
 0x161   : > { %771 = vst [vmem:[%s1528_s16 + $0x1e0] sm:$0xff] %v706_v40  ;;  %v642_v46 = vadd.f32 %v641_v44, %v1514_v42  ;;  %v643_v47 = vpop.f32.mrb[63].mxu0  ;;  %1097 = vst [vmem:[%s1521_s13 + $0x1f0] sm:$0xff] %v1029_v45  ;;  %v1031_v48 = vpop.f32.mrb[63].mxu1 }
 0x162   : > { %772 = vst.msk [vmem:[%s1528_s16 + $0x1e8] sm:$0xff] %vm711_vm2, %v707_v41  ;;  %v644_v49 = vadd.f32 %v643_v47, %v1516_v43 }
 0x163   : > { %1098 = vst.msk [vmem:[%s1521_s13 + $0x1f8] sm:$0xff] %vm1035_vm1, %v1031_v48  ;;  %v708_v50 = vmax.f32 %v642_v46, 0.0 }
 0x164   : > { %v709_v51 = vmax.f32 %v644_v49, 0.0 }
 0x165   : > { %773 = vst [vmem:[%s1528_s16 + $0x1f0] sm:$0xff] %v708_v50 }
 0x166   : > { %774 = vst.msk [vmem:[%s1528_s16 + $0x1f8] sm:$0xff] %vm711_vm2, %v709_v51 }
 0x167 PF: > { %s16_s18 = sadd.s32 1, %s1289_s18  }
 0x168   : > { %p13_p4 = scmp.ge.s32.totalorder %s16_s18, 4  }
 0x16a   :  { %15 = sbr.rel (!%p13_p4) target bundleno = 1 (0x1), region = 78 }

</bundles_post_ra>
